<compile_context>
chip_gen: v5e
topology: v5e:2x2
jax: 0.10.0
libtpu: 0.0.40
codegen_flags: <defaults>
</compile_context>

<pallas_src>
import jax
import jax.numpy as jnp
from jax.experimental import pallas as pl
from jax.experimental.pallas import tpu as pltpu  # noqa: F401  (kept for TPU-specific tuning hooks)

# ---------------- problem configuration (small, deterministic) ----------------
N = 2                    # batch
IN_CH, OUT_CH = 2, 4     # channels
D = H = W = 8            # input spatial size
KD = KH = KW = 3         # kernel_size = 3 (per dim)
SD = SH = SW = 1         # stride = 1 (required by the flat-shift formulation)
PD = PH = PW = 1         # padding = 1

DP, HP, WP = D + 2 * PD, H + 2 * PH, W + 2 * PW
OD = (D + 2 * PD - KD) // SD + 1
OH = (H + 2 * PH - KH) // SH + 1
OW = (W + 2 * PW - KW) // SW + 1

L = DP * HP * WP                        # 1000 flattened padded voxels
LPAD = ((L + 127) // 128) * 128         # 1024 -> lane-aligned
KT = KD * KH * KW                       # 27 taps

MAX_SHIFT = (KD - 1) * HP * WP + (KH - 1) * WP + (KW - 1)          # 222
MAX_VALID_FLAT = (OD - 1) * HP * WP + (OH - 1) * WP + (OW - 1)     # 777

KROWS = N * KT * IN_CH + 1              # 109 im2col rows (incl. bias ones-row)
KPAD = ((KROWS + 7) // 8) * 8           # 112 -> sublane-aligned contraction dim

# Static safety checks (future-proofing the flat-index construction).
assert (SD, SH, SW) == (1, 1, 1), "flat-shift im2col requires stride 1"
assert MAX_VALID_FLAT + MAX_SHIFT < L, "valid outputs must never read past the padded volume"
assert KROWS <= KPAD


# --------------------------------- kernel -------------------------------------
def conv3d_kernel(w_ref, im_ref, o_ref):
    # w_ref : (N*OUT_CH, KPAD)  block-diagonal weights + bias column
    # im_ref: (KPAD, LPAD)      im2col tap matrix + ones row (+ zero pad rows)
    # o_ref : (N*OUT_CH, LPAD)  fully dense output slab
    o_ref[...] = jnp.dot(w_ref[...], im_ref[...],
                         preferred_element_type=jnp.float32)


# -------------------------------- wrapper --------------------------------------
def convNd_pallas(x_ncdhw, weight_oidhw, bias):
    """x: (N, C_in, D, H, W); weight: (C_out, C_in, KD, KH, KW); bias: (C_out,)."""
    xf = x_ncdhw.astype(jnp.float32)

    # Zero-pad all spatial dims (== module's F.pad + Conv2d padding), flatten the
    # padded volume onto the lane axis (padded strides HP*WP, WP, 1).
    x_p = jnp.pad(xf, ((0, 0), (0, 0), (PD, PD), (PH, PH), (PW, PW)))
    x_flat = x_p.reshape(N, IN_CH, L)
    # Extend with zeros so every static tap slice of length LPAD is in-bounds.
    x_ext = jnp.pad(x_flat, ((0, 0), (0, 0), (0, LPAD + MAX_SHIFT - L)))

    # im2col: 27 static shifted slices; row order within a batch block is
    # tap-major, channel-minor (matches the weight reshape below).
    tap_rows = []
    for kd in range(KD):
        for kh in range(KH):
            for kw in range(KW):
                s = kd * HP * WP + kh * WP + kw
                tap_rows.append(x_ext[:, :, s:s + LPAD])          # (N, C_in, LPAD)
    im = jnp.stack(tap_rows, axis=1)                              # (N, KT, C_in, LPAD)
    im = im.reshape(N * KT * IN_CH, LPAD)                         # row = n*54 + t*2 + c
    ones_row = jnp.ones((1, LPAD), jnp.float32)                   # bias rides the MXU
    pad_rows = jnp.zeros((KPAD - KROWS, LPAD), jnp.float32)
    im2col = jnp.concatenate([im, ones_row, pad_rows], axis=0)    # (KPAD, LPAD)

    # Weight: (C_out, C_in, KD, KH, KW) -> (C_out, KT*C_in), column = t*C_in + c,
    # then block-diagonal over the batch plus a bias column.
    w2 = jnp.transpose(weight_oidhw, (0, 2, 3, 4, 1)).reshape(OUT_CH, KT * IN_CH)
    w2 = w2.astype(jnp.float32)
    w_block = jnp.zeros((N * OUT_CH, KPAD), jnp.float32)
    for n in range(N):
        w_block = w_block.at[n * OUT_CH:(n + 1) * OUT_CH,
                             n * KT * IN_CH:(n + 1) * KT * IN_CH].set(w2)
    w_block = w_block.at[:, KROWS - 1].set(jnp.tile(bias.astype(jnp.float32), N))

    out_flat = pl.pallas_call(
        conv3d_kernel,
        out_shape=jax.ShapeDtypeStruct((N * OUT_CH, LPAD), jnp.float32),
        grid=(1,),  # single step: no pipelining, no per-step overhead
        in_specs=[
            pl.BlockSpec((N * OUT_CH, KPAD), lambda i: (0, 0)),
            pl.BlockSpec((KPAD, LPAD), lambda i: (0, 0)),
        ],
        out_specs=pl.BlockSpec((N * OUT_CH, LPAD), lambda i: (0, 0)),
    )(w_block, im2col)

    # Rows are (n*OUT_CH + c); lanes use padded strides -> un-flatten and crop.
    out = out_flat.reshape(N, OUT_CH, LPAD)[:, :, :L]
    out = out.reshape(N, OUT_CH, DP, HP, WP)[:, :, :OD, :OH, :OW]
    return out.astype(x_ncdhw.dtype)


# --------------------------------- main ----------------------------------------
if __name__ == "__main__":
    key = jax.random.PRNGKey(0)
    k_x, k_w, k_b = jax.random.split(key, 3)

    # Deterministic synthetic parameters (shapes follow convNd.__init__:
    # KD Conv2d layers with weight (C_out, C_in, KH, KW) stacked -> (C_out, C_in, KD, KH, KW),
    # plus bias (C_out,)).
    x = jax.random.normal(k_x, (N, IN_CH, D, H, W), dtype=jnp.float32)
    weight = 0.1 * jax.random.normal(k_w, (OUT_CH, IN_CH, KD, KH, KW), dtype=jnp.float32)
    bias = 0.1 * jax.random.normal(k_b, (OUT_CH,), dtype=jnp.float32)

    out = jax.jit(convNd_pallas)(x, weight, bias)
    out = jax.block_until_ready(out)

    # Pure-JAX reference (the convNd forward == conv3d + bias for this config).
    dn = jax.lax.conv_dimension_numbers(x.shape, weight.shape,
                                        ("NCDHW", "OIDHW", "NCDHW"))
    ref = jax.lax.conv_general_dilated(
        x, weight, window_strides=(SD, SH, SW),
        padding=((PD, PD), (PH, PH), (PW, PW)),
        dimension_numbers=dn)
    ref = ref + bias[None, :, None, None, None]

    assert out.shape == (N, OUT_CH, OD, OH, OW), out.shape
    max_err = float(jnp.abs(out - ref).max())
    assert jnp.allclose(out, ref, atol=1e-4, rtol=1e-4), max_err
    print("KERNEL_OK")
</pallas_src>

<mosaic_0001>
module attributes {stable_mosaic.version = 11 : i64} {
  func.func @conv3d_kernel(%arg0: i32, %arg1: memref<8x112xf32, #tpu.memory_space<vmem>>, %arg2: memref<112x1024xf32, #tpu.memory_space<vmem>>, %arg3: memref<8x1024xf32, #tpu.memory_space<vmem>>) attributes {dimension_semantics = [#tpu.dimension_semantics<arbitrary>], iteration_bounds = array<i64: 1>, scalar_prefetch = 0 : i64, scratch_operands = 0 : i64, tpu.core_type = #tpu.core_type<tc>, window_params = [{pipeline_mode = #tpu.pipeline_mode<synchronous>, transform_indices = @transform_0, window_bounds = array<i64: 8, 112>}, {pipeline_mode = #tpu.pipeline_mode<synchronous>, transform_indices = @transform_1, window_bounds = array<i64: 112, 1024>}, {pipeline_mode = #tpu.pipeline_mode<synchronous>, transform_indices = @transform_2, window_bounds = array<i64: 8, 1024>}]} {
    %c0 = arith.constant 0 : index
    %c0_0 = arith.constant 0 : index
    %0 = vector.load %arg1[%c0, %c0_0] : memref<8x112xf32, #tpu.memory_space<vmem>>, vector<8x112xf32>
    %c0_1 = arith.constant 0 : index
    %c0_2 = arith.constant 0 : index
    %1 = vector.load %arg2[%c0_1, %c0_2] : memref<112x1024xf32, #tpu.memory_space<vmem>>, vector<112x1024xf32>
    %cst = arith.constant dense<0.000000e+00> : vector<8x1024xf32>
    %2 = tpu.matmul %0, %1, %cst {dimension_numbers = #tpu.dot_dimension_numbers<[1], [0], [0], [1], [0, 0, 1, 1], [], []>} : vector<8x112xf32>, vector<112x1024xf32>, vector<8x1024xf32> -> vector<8x1024xf32>
    %c0_3 = arith.constant 0 : index
    %c0_4 = arith.constant 0 : index
    %3 = vector.load %arg3[%c0_3, %c0_4] : memref<8x1024xf32, #tpu.memory_space<vmem>>, vector<8x1024xf32>
    tpu.vector_store %arg3[%c0_3, %c0_4], %2 {strides = array<i32>} : memref<8x1024xf32, #tpu.memory_space<vmem>>, vector<8x1024xf32>,
    return
  }
  func.func @transform_0(%arg0: i32) -> (i32, i32) {
    %c0_i32 = arith.constant 0 : i32
    %c0_i32_0 = arith.constant 0 : i32
    %c0_i32_1 = arith.constant 0 : i32
    return %c0_i32, %c0_i32_0 : i32, i32
  }
  func.func @transform_1(%arg0: i32) -> (i32, i32) {
    %c0_i32 = arith.constant 0 : i32
    %c0_i32_0 = arith.constant 0 : i32
    %c0_i32_1 = arith.constant 0 : i32
    return %c0_i32, %c0_i32_0 : i32, i32
  }
  func.func @transform_2(%arg0: i32) -> (i32, i32) {
    %c0_i32 = arith.constant 0 : i32
    %c0_i32_0 = arith.constant 0 : i32
    %c0_i32_1 = arith.constant 0 : i32
    return %c0_i32, %c0_i32_0 : i32, i32
  }
}

</mosaic_0001>

<bundles_post_ra>
// kernel: tile.8
= control target key start
LH: loop header
LB: loop body
LE: loop exit
PB: predicated region body
PF: predicated region fallthrough
CT: control target
= control target key end

     0   :  { %s22_s0 = inlined_call_operand.vmem [shape: f32[4], index: 0, kind: input, shape index: {}]   ;;  %s23_s1 = inlined_call_operand.vmem [shape: f32[2,4], index: 1, kind: output, shape index: {}]  }
   0x1   :  { %v4_v0 = vld [vmem:[%s22_s0] ss:$0 sm:$0xff] }
   0x2   :  { %5 = vst [vmem:[%s23_s1] sm:$0x3] %v4_v0 }

// kernel: convNd_pallas.1
= control target key start
LH: loop header
LB: loop body
LE: loop exit
PB: predicated region body
PF: predicated region fallthrough
CT: control target
= control target key end

     0   :  { %vm124_vm0 = vcmask 916480   ;;  %s694_s1 = inlined_call_operand.vmem [shape: f32[112,1024], index: 1, kind: input, shape index: {}]   ;;  %s695_s0 = inlined_call_operand.vmem [shape: f32[8,112], index: 0, kind: input, shape index: {}]   ;;  %s696_s2 = inlined_call_operand.vmem [shape: f32[8,1024], index: 2, kind: output, shape index: {}]  }
   0x1   :  { %v118_v0 = vld [vmem:[%s694_s1 + $0x350] sm:$0xff]  ;;  %v119_v1 = vld [vmem:[%s694_s1 + $0x358] sm:$0xff]  ;;  %v116_v6 = vld [vmem:[%s694_s1 + $0x340] sm:$0xff] }
   0x2   :  { %v110_v2 = vld [vmem:[%s694_s1 + $0x310] sm:$0xff]  ;;  %170 = vmatpush.msra.mxu2 %v118_v0  ;;  %190 = vmatpush.msra.mxu3 %v119_v1  ;;  %v111_v3 = vld [vmem:[%s694_s1 + $0x318] sm:$0xff]  ;;  %v117_v7 = vld [vmem:[%s694_s1 + $0x348] sm:$0xff] }
   0x3   :  { %v102_v4 = vld [vmem:[%s694_s1 + $0x2d0] sm:$0xff]  ;;  %v103_v5 = vld [vmem:[%s694_s1 + $0x2d8] sm:$0xff]  ;;  %v108_v8 = vld [vmem:[%s694_s1 + $0x300] sm:$0xff]  ;;  %130 = vmatpush.msra.mxu0 %v116_v6  ;;  %150 = vmatpush.msra.mxu1 %v117_v7 }
   0x4   :  { %171 = vmatpush.msra.mxu2 %v110_v2  ;;  %191 = vmatpush.msra.mxu3 %v111_v3  ;;  %v109_v9 = vld [vmem:[%s694_s1 + $0x308] sm:$0xff]  ;;  %v94_v10 = vld [vmem:[%s694_s1 + $0x290] sm:$0xff]  ;;  %v95_v11 = vld [vmem:[%s694_s1 + $0x298] sm:$0xff] }
   0x5   :  { %v100_v12 = vld [vmem:[%s694_s1 + $0x2c0] sm:$0xff]  ;;  %v101_v13 = vld [vmem:[%s694_s1 + $0x2c8] sm:$0xff]  ;;  %131 = vmatpush.msra.mxu0 %v108_v8  ;;  %151 = vmatpush.msra.mxu1 %v109_v9  ;;  %v86_v14 = vld [vmem:[%s694_s1 + $0x250] sm:$0xff] }
   0x6   :  { %172 = vmatpush.msra.mxu2 %v102_v4  ;;  %192 = vmatpush.msra.mxu3 %v103_v5  ;;  %v87_v15 = vld [vmem:[%s694_s1 + $0x258] sm:$0xff]  ;;  %v92_v16 = vld [vmem:[%s694_s1 + $0x280] sm:$0xff]  ;;  %v93_v17 = vld [vmem:[%s694_s1 + $0x288] sm:$0xff] }
   0x7   :  { %132 = vmatpush.msra.mxu0 %v100_v12  ;;  %152 = vmatpush.msra.mxu1 %v101_v13  ;;  %v78_v18 = vld [vmem:[%s694_s1 + $0x210] sm:$0xff]  ;;  %v79_v19 = vld [vmem:[%s694_s1 + $0x218] sm:$0xff]  ;;  %v84_v20 = vld [vmem:[%s694_s1 + $0x240] sm:$0xff] }
   0x8   :  { %173 = vmatpush.msra.mxu2 %v94_v10  ;;  %193 = vmatpush.msra.mxu3 %v95_v11  ;;  %v85_v21 = vld [vmem:[%s694_s1 + $0x248] sm:$0xff]  ;;  %v70_v22 = vld [vmem:[%s694_s1 + $0x1d0] sm:$0xff]  ;;  %v71_v23 = vld [vmem:[%s694_s1 + $0x1d8] sm:$0xff] }
   0x9   :  { %133 = vmatpush.msra.mxu0 %v92_v16  ;;  %153 = vmatpush.msra.mxu1 %v93_v17  ;;  %v76_v24 = vld [vmem:[%s694_s1 + $0x200] sm:$0xff]  ;;  %v77_v25 = vld [vmem:[%s694_s1 + $0x208] sm:$0xff]  ;;  %v62_v26 = vld [vmem:[%s694_s1 + $0x190] sm:$0xff] }
   0xa   :  { %174 = vmatpush.msra.mxu2 %v86_v14  ;;  %194 = vmatpush.msra.mxu3 %v87_v15  ;;  %v63_v27 = vld [vmem:[%s694_s1 + $0x198] sm:$0xff]  ;;  %v68_v28 = vld [vmem:[%s694_s1 + $0x1c0] sm:$0xff]  ;;  %v69_v29 = vld [vmem:[%s694_s1 + $0x1c8] sm:$0xff] }
   0xb   :  { %134 = vmatpush.msra.mxu0 %v84_v20  ;;  %154 = vmatpush.msra.mxu1 %v85_v21  ;;  %v54_v30 = vld [vmem:[%s694_s1 + $0x150] sm:$0xff]  ;;  %v55_v31 = vld [vmem:[%s694_s1 + $0x158] sm:$0xff]  ;;  %v60_v32 = vld [vmem:[%s694_s1 + $0x180] sm:$0xff] }
   0xc   :  { %175 = vmatpush.msra.mxu2 %v78_v18  ;;  %195 = vmatpush.msra.mxu3 %v79_v19  ;;  %v61_v33 = vld [vmem:[%s694_s1 + $0x188] sm:$0xff]  ;;  %v46_v34 = vld [vmem:[%s694_s1 + $0x110] sm:$0xff]  ;;  %v47_v35 = vld [vmem:[%s694_s1 + $0x118] sm:$0xff] }
   0xd   :  { %135 = vmatpush.msra.mxu0 %v76_v24  ;;  %155 = vmatpush.msra.mxu1 %v77_v25  ;;  %v52_v36 = vld [vmem:[%s694_s1 + $0x140] sm:$0xff]  ;;  %v53_v37 = vld [vmem:[%s694_s1 + $0x148] sm:$0xff]  ;;  %v38_v38 = vld [vmem:[%s694_s1 + $0xd0] sm:$0xff] }
   0xe   :  { %176 = vmatpush.msra.mxu2 %v70_v22  ;;  %196 = vmatpush.msra.mxu3 %v71_v23  ;;  %v39_v39 = vld [vmem:[%s694_s1 + $0xd8] sm:$0xff]  ;;  %v44_v40 = vld [vmem:[%s694_s1 + $0x100] sm:$0xff]  ;;  %v45_v41 = vld [vmem:[%s694_s1 + $0x108] sm:$0xff] }
   0xf   :  { %136 = vmatpush.msra.mxu0 %v68_v28  ;;  %156 = vmatpush.msra.mxu1 %v69_v29  ;;  %v30_v42 = vld [vmem:[%s694_s1 + $0x90] sm:$0xff]  ;;  %v31_v43 = vld [vmem:[%s694_s1 + $0x98] sm:$0xff]  ;;  %v36_v44 = vld [vmem:[%s694_s1 + $0xc0] sm:$0xff] }
  0x10   :  { %177 = vmatpush.msra.mxu2 %v62_v26  ;;  %197 = vmatpush.msra.mxu3 %v63_v27  ;;  %v37_v45 = vld [vmem:[%s694_s1 + $0xc8] sm:$0xff]  ;;  %v22_v46 = vld [vmem:[%s694_s1 + $0x50] sm:$0xff]  ;;  %v23_v47 = vld [vmem:[%s694_s1 + $0x58] sm:$0xff] }
  0x11   :  { %137 = vmatpush.msra.mxu0 %v60_v32  ;;  %157 = vmatpush.msra.mxu1 %v61_v33  ;;  %v28_v48 = vld [vmem:[%s694_s1 + $0x80] sm:$0xff]  ;;  %v29_v49 = vld [vmem:[%s694_s1 + $0x88] sm:$0xff]  ;;  %v14_v50 = vld [vmem:[%s694_s1 + $0x10] sm:$0xff] }
  0x12   :  { %178 = vmatpush.msra.mxu2 %v54_v30  ;;  %198 = vmatpush.msra.mxu3 %v55_v31  ;;  %v15_v51 = vld [vmem:[%s694_s1 + $0x18] sm:$0xff]  ;;  %v122_v52 = vld [vmem:[%s694_s1 + $0x370] sm:$0xff]  ;;  %v20_v54 = vld [vmem:[%s694_s1 + $0x40] sm:$0xff] }
  0x13   :  { %138 = vmatpush.msra.mxu0 %v52_v36  ;;  %158 = vmatpush.msra.mxu1 %v53_v37  ;;  %v123_v53 = vld [vmem:[%s694_s1 + $0x378] sm:$0xff]  ;;  %v21_v55 = vld [vmem:[%s694_s1 + $0x48] sm:$0xff]  ;;  %v114_v56 = vld [vmem:[%s694_s1 + $0x330] sm:$0xff] }
  0x14   :  { %179 = vmatpush.msra.mxu2 %v46_v34  ;;  %199 = vmatpush.msra.mxu3 %v47_v35  ;;  %v115_v57 = vld [vmem:[%s694_s1 + $0x338] sm:$0xff]  ;;  %v12_v58 = vld [vmem:[%s694_s1] sm:$0xff]  ;;  %v13_v59 = vld [vmem:[%s694_s1 + $0x8] sm:$0xff] }
  0x15   :  { %139 = vmatpush.msra.mxu0 %v44_v40  ;;  %159 = vmatpush.msra.mxu1 %v45_v41  ;;  %v106_v60 = vld [vmem:[%s694_s1 + $0x2f0] sm:$0xff]  ;;  %v107_v61 = vld [vmem:[%s694_s1 + $0x2f8] sm:$0xff]  ;;  %v120_v62 = vld [vmem:[%s694_s1 + $0x360] sm:$0xff] }
  0x16   :  { %180 = vmatpush.msra.mxu2 %v38_v38  ;;  %200 = vmatpush.msra.mxu3 %v39_v39  ;;  %v121_v63 = vld [vmem:[%s694_s1 + $0x368] sm:$0xff]  ;;  %v98_v0 = vld [vmem:[%s694_s1 + $0x2b0] sm:$0xff]  ;;  %v99_v1 = vld [vmem:[%s694_s1 + $0x2b8] sm:$0xff] }
  0x17   :  { %140 = vmatpush.msra.mxu0 %v36_v44  ;;  %160 = vmatpush.msra.mxu1 %v37_v45  ;;  %v112_v2 = vld [vmem:[%s694_s1 + $0x320] sm:$0xff]  ;;  %v113_v3 = vld [vmem:[%s694_s1 + $0x328] sm:$0xff]  ;;  %v90_v4 = vld [vmem:[%s694_s1 + $0x270] sm:$0xff] }
  0x18   :  { %181 = vmatpush.msra.mxu2 %v30_v42  ;;  %201 = vmatpush.msra.mxu3 %v31_v43  ;;  %v91_v5 = vld [vmem:[%s694_s1 + $0x278] sm:$0xff]  ;;  %v104_v6 = vld [vmem:[%s694_s1 + $0x2e0] sm:$0xff]  ;;  %v105_v7 = vld [vmem:[%s694_s1 + $0x2e8] sm:$0xff] }
  0x19   :  { %141 = vmatpush.msra.mxu0 %v28_v48  ;;  %161 = vmatpush.msra.mxu1 %v29_v49  ;;  %v82_v8 = vld [vmem:[%s694_s1 + $0x230] sm:$0xff]  ;;  %v83_v9 = vld [vmem:[%s694_s1 + $0x238] sm:$0xff]  ;;  %v96_v10 = vld [vmem:[%s694_s1 + $0x2a0] sm:$0xff] }
  0x1a   :  { %182 = vmatpush.msra.mxu2 %v22_v46  ;;  %202 = vmatpush.msra.mxu3 %v23_v47  ;;  %v97_v11 = vld [vmem:[%s694_s1 + $0x2a8] sm:$0xff]  ;;  %v74_v12 = vld [vmem:[%s694_s1 + $0x1f0] sm:$0xff]  ;;  %v75_v13 = vld [vmem:[%s694_s1 + $0x1f8] sm:$0xff] }
  0x1b   :  { %142 = vmatpush.msra.mxu0 %v20_v54  ;;  %162 = vmatpush.msra.mxu1 %v21_v55  ;;  %v88_v14 = vld [vmem:[%s694_s1 + $0x260] sm:$0xff]  ;;  %v89_v15 = vld [vmem:[%s694_s1 + $0x268] sm:$0xff]  ;;  %v66_v16 = vld [vmem:[%s694_s1 + $0x1b0] sm:$0xff] }
  0x1c   :  { %183 = vmatpush.msra.mxu2 %v14_v50  ;;  %203 = vmatpush.msra.mxu3 %v15_v51  ;;  %v67_v17 = vld [vmem:[%s694_s1 + $0x1b8] sm:$0xff]  ;;  %v80_v18 = vld [vmem:[%s694_s1 + $0x220] sm:$0xff]  ;;  %v81_v19 = vld [vmem:[%s694_s1 + $0x228] sm:$0xff] }
  0x1d   :  { %143 = vmatpush.msra.mxu0 %v12_v58  ;;  %163 = vmatpush.msra.mxu1 %v13_v59  ;;  %v58_v20 = vld [vmem:[%s694_s1 + $0x170] sm:$0xff]  ;;  %v59_v21 = vld [vmem:[%s694_s1 + $0x178] sm:$0xff]  ;;  %v72_v22 = vld [vmem:[%s694_s1 + $0x1e0] sm:$0xff] }
  0x1e   :  { %250 = vmatpush.msrb.mxu2 %v122_v52  ;;  %270 = vmatpush.msrb.mxu3 %v123_v53  ;;  %v73_v23 = vld [vmem:[%s694_s1 + $0x1e8] sm:$0xff]  ;;  %v50_v24 = vld [vmem:[%s694_s1 + $0x130] sm:$0xff]  ;;  %v51_v25 = vld [vmem:[%s694_s1 + $0x138] sm:$0xff] }
  0x1f   :  { %210 = vmatpush.msrb.mxu0 %v120_v62  ;;  %230 = vmatpush.msrb.mxu1 %v121_v63  ;;  %v11_v26 = vld [vmem:[%s695_s0] sm:$0xff]  ;;  %v65_v28 = vld [vmem:[%s694_s1 + $0x1a8] sm:$0xff]  ;;  %v42_v29 = vld [vmem:[%s694_s1 + $0xf0] sm:$0xff] }
  0x20   :  { %251 = vmatpush.msrb.mxu2 %v114_v56  ;;  %271 = vmatpush.msrb.mxu3 %v115_v57  ;;  %v64_v27 = vld [vmem:[%s694_s1 + $0x1a0] sm:$0xff]  ;;  %v43_v30 = vld [vmem:[%s694_s1 + $0xf8] sm:$0xff]  ;;  %v57_v32 = vld [vmem:[%s694_s1 + $0x168] sm:$0xff] }
  0x21   :  { %211 = vmatpush.msrb.mxu0 %v112_v2  ;;  %231 = vmatpush.msrb.mxu1 %v113_v3  ;;  %v56_v31 = vld [vmem:[%s694_s1 + $0x160] sm:$0xff]  ;;  %v34_v33 = vld [vmem:[%s694_s1 + $0xb0] sm:$0xff]  ;;  %v35_v34 = vld [vmem:[%s694_s1 + $0xb8] sm:$0xff] }
  0x22   :  { %252 = vmatpush.msrb.mxu2 %v106_v60  ;;  %272 = vmatpush.msrb.mxu3 %v107_v61  ;;  %v48_v35 = vld [vmem:[%s694_s1 + $0x120] sm:$0xff]  ;;  %v49_v36 = vld [vmem:[%s694_s1 + $0x128] sm:$0xff]  ;;  %v26_v37 = vld [vmem:[%s694_s1 + $0x70] sm:$0xff] }
  0x23   :  { %212 = vmatpush.msrb.mxu0 %v104_v6  ;;  %232 = vmatpush.msrb.mxu1 %v105_v7  ;;  %v27_v38 = vld [vmem:[%s694_s1 + $0x78] sm:$0xff]  ;;  %v40_v39 = vld [vmem:[%s694_s1 + $0xe0] sm:$0xff]  ;;  %v41_v40 = vld [vmem:[%s694_s1 + $0xe8] sm:$0xff] }
  0x24   :  { %253 = vmatpush.msrb.mxu2 %v98_v0  ;;  %273 = vmatpush.msrb.mxu3 %v99_v1  ;;  %v18_v41 = vld [vmem:[%s694_s1 + $0x30] sm:$0xff]  ;;  %v19_v42 = vld [vmem:[%s694_s1 + $0x38] sm:$0xff]  ;;  %v32_v43 = vld [vmem:[%s694_s1 + $0xa0] sm:$0xff] }
  0x25   :  { %213 = vmatpush.msrb.mxu0 %v96_v10  ;;  %233 = vmatpush.msrb.mxu1 %v97_v11  ;;  %v33_v44 = vld [vmem:[%s694_s1 + $0xa8] sm:$0xff]  ;;  %v24_v45 = vld [vmem:[%s694_s1 + $0x60] sm:$0xff] }
  0x26   :  { %254 = vmatpush.msrb.mxu2 %v90_v4  ;;  %274 = vmatpush.msrb.mxu3 %v91_v5  ;;  %v25_v46 = vld [vmem:[%s694_s1 + $0x68] sm:$0xff]  ;;  %v16_v47 = vld [vmem:[%s694_s1 + $0x20] sm:$0xff] }
  0x27   :  { %214 = vmatpush.msrb.mxu0 %v88_v14  ;;  %234 = vmatpush.msrb.mxu1 %v89_v15  ;;  %v17_v48 = vld [vmem:[%s694_s1 + $0x28] sm:$0xff] }
  0x28   :  { %255 = vmatpush.msrb.mxu2 %v82_v8  ;;  %275 = vmatpush.msrb.mxu3 %v83_v9 }
  0x29   :  { %215 = vmatpush.msrb.mxu0 %v80_v18  ;;  %235 = vmatpush.msrb.mxu1 %v81_v19 }
  0x2a   :  { %256 = vmatpush.msrb.mxu2 %v74_v12  ;;  %276 = vmatpush.msrb.mxu3 %v75_v13 }
  0x2b   :  { %216 = vmatpush.msrb.mxu0 %v72_v22  ;;  %236 = vmatpush.msrb.mxu1 %v73_v23 }
  0x2c   :  { %257 = vmatpush.msrb.mxu2 %v66_v16  ;;  %277 = vmatpush.msrb.mxu3 %v67_v17 }
  0x2d   :  { %302 = vmatmul.msk.f32.vlgmr.msra.gmra.mxu2 %vm124_vm0, %v11_v26  ;;  %303 = vmatmul.msk.f32.vlgmr.msra.gmra.mxu3 %vm124_vm0, %v11_v26 }
  0x2e   :  { %258 = vmatpush.msrb.mxu2 %v58_v20  ;;  %278 = vmatpush.msrb.mxu3 %v59_v21 }
  0x2f   :  { %217 = vmatpush.msrb.mxu0 %v64_v27  ;;  %237 = vmatpush.msrb.mxu1 %v65_v28 }
  0x30   :  { %259 = vmatpush.msrb.mxu2 %v50_v24  ;;  %279 = vmatpush.msrb.mxu3 %v51_v25 }
  0x31   :  { %218 = vmatpush.msrb.mxu0 %v56_v31  ;;  %238 = vmatpush.msrb.mxu1 %v57_v32 }
  0x32   :  { %260 = vmatpush.msrb.mxu2 %v42_v29  ;;  %280 = vmatpush.msrb.mxu3 %v43_v30 }
  0x33   :  { %219 = vmatpush.msrb.mxu0 %v48_v35  ;;  %239 = vmatpush.msrb.mxu1 %v49_v36 }
  0x34   :  { %261 = vmatpush.msrb.mxu2 %v34_v33  ;;  %281 = vmatpush.msrb.mxu3 %v35_v34 }
  0x35   :  { %300 = vmatmul.msk.f32.vlgmr.msra.gmra.mxu0 %vm124_vm0, %v11_v26  ;;  %301 = vmatmul.msk.f32.vlgmr.msra.gmra.mxu1 %vm124_vm0, %v11_v26 }
  0x36   :  { %262 = vmatpush.msrb.mxu2 %v26_v37  ;;  %282 = vmatpush.msrb.mxu3 %v27_v38 }
  0x37   :  { %220 = vmatpush.msrb.mxu0 %v40_v39  ;;  %240 = vmatpush.msrb.mxu1 %v41_v40 }
  0x38   :  { %263 = vmatpush.msrb.mxu2 %v18_v41  ;;  %283 = vmatpush.msrb.mxu3 %v19_v42 }
  0x39   :  { %306 = vmatmul.msk.f32.vlgmr.msrb.gmra.mxu2 %vm124_vm0, %v11_v26  ;;  %307 = vmatmul.msk.f32.vlgmr.msrb.gmra.mxu3 %vm124_vm0, %v11_v26 }
  0x3a   :  { %221 = vmatpush.msrb.mxu0 %v32_v43  ;;  %241 = vmatpush.msrb.mxu1 %v33_v44 }
  0x3c   :  { %222 = vmatpush.msrb.mxu0 %v24_v45  ;;  %242 = vmatpush.msrb.mxu1 %v25_v46 }
  0x3e   :  { %223 = vmatpush.msrb.mxu0 %v16_v47  ;;  %243 = vmatpush.msrb.mxu1 %v17_v48 }
  0x3f   :  { %304 = vmatmul.msk.f32.vlgmr.msrb.gmra.mxu0 %vm124_vm0, %v11_v26  ;;  %305 = vmatmul.msk.f32.vlgmr.msrb.gmra.mxu1 %vm124_vm0, %v11_v26 }
  0xb0   :  { %v185_v49 = vpop.f32.mrf.mxu2  ;;  %v205_v50 = vpop.f32.mrf.mxu3 }
  0xb1   :  { %290 = vst [vmem:[%s696_s2 + $0x10] sm:$0xff] %v185_v49 }
  0xb2   :  { %v145_v51 = vpop.f32.mrf.mxu0  ;;  %v165_v52 = vpop.f32.mrf.mxu1  ;;  %291 = vst [vmem:[%s696_s2 + $0x18] sm:$0xff] %v205_v50 }
  0xb3   :  { %288 = vst [vmem:[%s696_s2] sm:$0xff] %v145_v51 }
  0xb4   :  { %289 = vst [vmem:[%s696_s2 + $0x8] sm:$0xff] %v165_v52 }
  0xbc   :  { %v225_v53 = vpop.f32.mrf.mxu0  ;;  %v245_v54 = vpop.f32.mrf.mxu1 }
  0xbd   :  { %292 = vst [vmem:[%s696_s2 + $0x20] sm:$0xff] %v225_v53  ;;  %v265_v55 = vpop.f32.mrf.mxu2  ;;  %v285_v56 = vpop.f32.mrf.mxu3 }
  0xbe   :  { %293 = vst [vmem:[%s696_s2 + $0x28] sm:$0xff] %v245_v54 }
  0xbf   :  { %294 = vst [vmem:[%s696_s2 + $0x30] sm:$0xff] %v265_v55 }
  0xc0   :  { %295 = vst [vmem:[%s696_s2 + $0x38] sm:$0xff] %v285_v56 }

</bundles_post_ra>
